<compile_context>
chip_gen: v7x
topology: tpu7x:2x2x1
jax: 0.10.0
libtpu: 0.0.40
codegen_flags: <defaults>
</compile_context>

<pallas_src>
import jax
import jax.numpy as jnp
from jax import lax
from jax.experimental import pallas as pl
from jax.experimental.pallas import tpu as pltpu


def _round_up(v, m):
    return (v + m - 1) // m * m


def _default_plan():
    """(batch_tile, feat_tile, vmem_limit_bytes) chosen per TPU generation."""
    vmem_cap = 64 * 1024 * 1024
    try:
        info = pltpu.get_tpu_info()
        vmem_cap = int(getattr(info, "vmem_capacity_bytes", vmem_cap))
    except Exception:
        pass
    if vmem_cap >= 100 * 1024 * 1024:       # v5e / v6e: 128 MiB VMEM
        return 256, 2048, 96 * 1024 * 1024
    return 128, 1536, 48 * 1024 * 1024      # v7x: 64 MiB VMEM per core


def _batch_tiling(B, batch_tile):
    batch_tile = max(8, _round_up(int(batch_tile), 8))   # guard: sublane rule
    if B > batch_tile:
        tb = batch_tile
    elif B >= 16:
        # Guarantee >= 2 grid steps so both TensorCores (v7x) get work and the
        # auto-pipeline has something to overlap with.
        tb = _round_up(pl.cdiv(B, 2), 8)
    else:
        tb = B   # full-dim batch block (legal even when B < 8)
    return tb, pl.cdiv(B, tb)


def _feat_tiling(N, feat_tile):
    feat_tile = max(128, _round_up(int(feat_tile), 128))
    if N <= feat_tile:
        return N, 1
    return feat_tile, pl.cdiv(N, feat_tile)


# ---------------------------------------------------------------------------
# Fused forward:  y = (x @ W_enc^T) @ W_dec^T + b_fold
#   grid = (batch tiles i  [parallel],  output-feature tiles j  [arbitrary])
#   x     : (tb, N)   resident across j (index map constant in j)
#   W_enc : (n,  N)   resident (constant index map) -- N on the lane axis
#   W_dec : (n,  tN)  streamed along j
#   b_fold: (1,  tN)  streamed along j
#   y     : (tb, tN)  streamed along j
# The latent z (tb, n) lives in a VMEM scratch, computed once per batch tile.
# ---------------------------------------------------------------------------
def _nrbs_fused_kernel(x_ref, we_ref, wd_ref, bf_ref, y_ref, z_ref):
    @pl.when(pl.program_id(1) == 0)
    def _():
        # Encoder: transposed-RHS contraction over the (lane) feature axis.
        z_ref[...] = lax.dot_general(
            x_ref[...], we_ref[...],
            dimension_numbers=(((1,), (1,)), ((), ())),
            preferred_element_type=jnp.float32,
        )

    # Decoder for the current output-feature tile.
    y = jnp.dot(z_ref[...].astype(wd_ref.dtype), wd_ref[...],
                preferred_element_type=jnp.float32)
    y_ref[...] = (y + bf_ref[...].astype(jnp.float32)).astype(y_ref.dtype)


def nrbs_forward(x, w_enc, w_dec_t, b_fold, *,
                 batch_tile=None, feat_tile=None, vmem_limit_bytes=None):
    B, N = x.shape
    n = w_enc.shape[0]
    assert w_enc.shape == (n, N)
    assert w_dec_t.shape == (n, N)
    assert b_fold.shape == (1, N)

    d_bt, d_ft, d_vmem = _default_plan()
    batch_tile = d_bt if batch_tile is None else batch_tile
    feat_tile = d_ft if feat_tile is None else feat_tile
    vmem_limit_bytes = d_vmem if vmem_limit_bytes is None else vmem_limit_bytes

    tb, gi = _batch_tiling(B, batch_tile)
    tn, gj = _feat_tiling(N, feat_tile)

    flops = 4 * B * N * n                       # two matmuls (2*B*N*n each)
    bytes_accessed = 4 * (2 * B * N + 2 * n * N + N + n)

    return pl.pallas_call(
        _nrbs_fused_kernel,
        out_shape=jax.ShapeDtypeStruct((B, N), x.dtype),
        grid_spec=pltpu.PrefetchScalarGridSpec(
            num_scalar_prefetch=0,
            grid=(gi, gj),
            in_specs=[
                pl.BlockSpec((tb, N), lambda i, j: (i, 0)),   # x  (resident over j)
                pl.BlockSpec((n, N), lambda i, j: (0, 0)),    # W_enc (resident)
                pl.BlockSpec((n, tn), lambda i, j: (0, j)),   # W_dec tile
                pl.BlockSpec((1, tn), lambda i, j: (0, j)),   # folded bias tile
            ],
            out_specs=pl.BlockSpec((tb, tn), lambda i, j: (i, j)),
            scratch_shapes=[pltpu.VMEM((tb, n), jnp.float32)],
        ),
        compiler_params=pltpu.CompilerParams(
            dimension_semantics=("parallel", "arbitrary"),
            vmem_limit_bytes=vmem_limit_bytes,
        ),
        cost_estimate=pl.CostEstimate(
            flops=flops, transcendentals=0, bytes_accessed=bytes_accessed
        ),
    )(x, w_enc, w_dec_t, b_fold)


# ---------------------------------------------------------------------------
# Standalone encode:  z = x @ W_enc^T + b_enc      (grid over batch only)
# Output is only (B, n) -- masked 10-wide stores are cheaper than padding the
# weight out to 128 lanes (perf-review item 10).
# ---------------------------------------------------------------------------
def _encode_kernel(x_ref, w_ref, b_ref, z_ref):
    z = lax.dot_general(
        x_ref[...], w_ref[...],
        dimension_numbers=(((1,), (1,)), ((), ())),
        preferred_element_type=jnp.float32,
    )
    z_ref[...] = (z + b_ref[...].astype(jnp.float32)).astype(z_ref.dtype)


def encode_linear(x, w_enc, b_enc, *, batch_tile=None, vmem_limit_bytes=None):
    B, N = x.shape
    n = w_enc.shape[0]
    assert w_enc.shape == (n, N) and b_enc.shape == (1, n)

    d_bt, _, d_vmem = _default_plan()
    batch_tile = d_bt if batch_tile is None else batch_tile
    vmem_limit_bytes = d_vmem if vmem_limit_bytes is None else vmem_limit_bytes
    tb, gi = _batch_tiling(B, batch_tile)

    return pl.pallas_call(
        _encode_kernel,
        out_shape=jax.ShapeDtypeStruct((B, n), x.dtype),
        grid_spec=pltpu.PrefetchScalarGridSpec(
            num_scalar_prefetch=0,
            grid=(gi,),
            in_specs=[
                pl.BlockSpec((tb, N), lambda i: (i, 0)),
                pl.BlockSpec((n, N), lambda i: (0, 0)),
                pl.BlockSpec((1, n), lambda i: (0, 0)),
            ],
            out_specs=pl.BlockSpec((tb, n), lambda i: (i, 0)),
        ),
        compiler_params=pltpu.CompilerParams(
            dimension_semantics=("parallel",),
            vmem_limit_bytes=vmem_limit_bytes,
        ),
        cost_estimate=pl.CostEstimate(
            flops=2 * B * N * n, transcendentals=0,
            bytes_accessed=4 * (B * N + n * N + n + B * n),
        ),
    )(x, w_enc, b_enc)


# ---------------------------------------------------------------------------
# Standalone decode:  y = z @ W_dec^T + b_dec   (grid over batch x feature tiles)
# ---------------------------------------------------------------------------
def _decode_kernel(z_ref, w_ref, b_ref, y_ref):
    y = jnp.dot(z_ref[...].astype(w_ref.dtype), w_ref[...],
                preferred_element_type=jnp.float32)
    y_ref[...] = (y + b_ref[...].astype(jnp.float32)).astype(y_ref.dtype)


def decode_linear(z, w_dec_t, b_dec, *,
                  batch_tile=None, feat_tile=None, vmem_limit_bytes=None):
    B, n = z.shape
    N = w_dec_t.shape[1]
    assert w_dec_t.shape == (n, N) and b_dec.shape == (1, N)

    d_bt, d_ft, d_vmem = _default_plan()
    batch_tile = d_bt if batch_tile is None else batch_tile
    feat_tile = d_ft if feat_tile is None else feat_tile
    vmem_limit_bytes = d_vmem if vmem_limit_bytes is None else vmem_limit_bytes
    tb, gi = _batch_tiling(B, batch_tile)
    tn, gj = _feat_tiling(N, feat_tile)

    return pl.pallas_call(
        _decode_kernel,
        out_shape=jax.ShapeDtypeStruct((B, N), z.dtype),
        grid_spec=pltpu.PrefetchScalarGridSpec(
            num_scalar_prefetch=0,
            grid=(gi, gj),
            in_specs=[
                pl.BlockSpec((tb, n), lambda i, j: (i, 0)),
                pl.BlockSpec((n, tn), lambda i, j: (0, j)),
                pl.BlockSpec((1, tn), lambda i, j: (0, j)),
            ],
            out_specs=pl.BlockSpec((tb, tn), lambda i, j: (i, j)),
        ),
        compiler_params=pltpu.CompilerParams(
            dimension_semantics=("parallel", "arbitrary"),
            vmem_limit_bytes=vmem_limit_bytes,
        ),
        cost_estimate=pl.CostEstimate(
            flops=2 * B * n * N, transcendentals=0,
            bytes_accessed=4 * (B * n + n * N + N + B * N),
        ),
    )(z, w_dec_t, b_dec)


class NRBS:
    """JAX/Pallas port of the PyTorch NRBS autoencoder (Linear(N,n) -> Linear(n,N))."""

    def __init__(self, N, n, key, dtype=jnp.float32):
        self.N = N
        self.n = n
        k1, k2, k3, k4 = jax.random.split(key, 4)
        # torch.nn.Linear-style init: U(-1/sqrt(fan_in), 1/sqrt(fan_in)).
        enc_bound = 1.0 / float(N) ** 0.5
        dec_bound = 1.0 / float(n) ** 0.5
        # Encoder weight in PyTorch layout (n, N): N on the lane axis.
        self.w_enc = jax.random.uniform(k1, (n, N), dtype, -enc_bound, enc_bound)
        self.b_enc = jax.random.uniform(k2, (1, n), dtype, -enc_bound, enc_bound)
        # Decoder weight pre-transposed once at init: (n, N), N on the lane axis.
        self.w_dec_t = jax.random.uniform(k3, (n, N), dtype, -dec_bound, dec_bound)
        self.b_dec = jax.random.uniform(k4, (1, N), dtype, -dec_bound, dec_bound)
        # Encoder bias folded into decoder bias (exact): computed once at init.
        self.b_fold = (self.b_enc @ self.w_dec_t + self.b_dec).astype(dtype)

    def encode(self, x):
        return encode_linear(x, self.w_enc, self.b_enc)

    def decode(self, z):
        return decode_linear(z, self.w_dec_t, self.b_dec)

    def forward(self, x):
        # Fused encode+decode: the latent never leaves the chip.
        return nrbs_forward(x, self.w_enc, self.w_dec_t, self.b_fold)

    __call__ = forward


if __name__ == "__main__":
    # Small shapes consistent with the module (real problem is N=121*121=14641,
    # n=10).  N is deliberately NOT a 128-multiple to exercise the masked-edge
    # (full-dim block) path.
    N_feat = 1000
    n_lat = 10
    batch = 8

    key = jax.random.PRNGKey(0)
    k_param, k_x, k_x2 = jax.random.split(key, 3)

    model = NRBS(N_feat, n_lat, k_param)
    x = jax.random.normal(k_x, (batch, N_feat), jnp.float32)

    # Fused forward.
    y = jax.block_until_ready(model(x))

    # Pure-JAX reference (unfolded bias).
    z_ref = x @ model.w_enc.T + model.b_enc
    y_ref = z_ref @ model.w_dec_t + model.b_dec
    assert y.shape == (batch, N_feat)
    assert jnp.allclose(y, y_ref, atol=1e-3, rtol=1e-3)

    # encode/decode API parity paths (separate kernels).
    z = jax.block_until_ready(model.encode(x))
    y2 = jax.block_until_ready(model.decode(z))
    assert z.shape == (batch, n_lat)
    assert jnp.allclose(z, z_ref, atol=1e-3, rtol=1e-3)
    assert jnp.allclose(y2, y_ref, atol=1e-3, rtol=1e-3)

    # Larger batch: default plan gives >= 2 batch tiles (partial trailing block).
    big_batch = 40
    xb = jax.random.normal(k_x2, (big_batch, N_feat), jnp.float32)
    yb = jax.block_until_ready(model(xb))
    yb_ref = (xb @ model.w_enc.T + model.b_enc) @ model.w_dec_t + model.b_dec
    assert yb.shape == (big_batch, N_feat)
    assert jnp.allclose(yb, yb_ref, atol=1e-3, rtol=1e-3)

    # Explicit small tiles: 3 batch tiles x 4 feature tiles, both with partial
    # trailing blocks (masked edge loads/stores).
    yb2 = jax.block_until_ready(
        nrbs_forward(xb, model.w_enc, model.w_dec_t, model.b_fold,
                     batch_tile=16, feat_tile=256))
    assert jnp.allclose(yb2, yb_ref, atol=1e-3, rtol=1e-3)

    print("KERNEL_OK")
</pallas_src>

<mosaic_0001>
module attributes {stable_mosaic.version = 11 : i64} {
  func.func @_nrbs_fused_kernel(%arg0: i32, %arg1: i32, %arg2: memref<8x1000xf32, #tpu.memory_space<vmem>>, %arg3: memref<10x1000xf32, #tpu.memory_space<vmem>>, %arg4: memref<10x1000xf32, #tpu.memory_space<vmem>>, %arg5: memref<1x1000xf32, #tpu.memory_space<vmem>>, %arg6: memref<8x1000xf32, #tpu.memory_space<vmem>>, %arg7: memref<8x10xf32, #tpu.memory_space<vmem>>) attributes {dimension_semantics = [#tpu.dimension_semantics<parallel>, #tpu.dimension_semantics<arbitrary>], iteration_bounds = array<i64: 1, 1>, scalar_prefetch = 0 : i64, scratch_operands = 1 : i64, tpu.core_type = #tpu.core_type<tc>, window_params = [{transform_indices = @transform_0, window_bounds = array<i64: 8, 1000>}, {pipeline_mode = #tpu.pipeline_mode<synchronous>, transform_indices = @transform_1, window_bounds = array<i64: 10, 1000>}, {transform_indices = @transform_2, window_bounds = array<i64: 10, 1000>}, {transform_indices = @transform_3, window_bounds = array<i64: 1, 1000>}, {transform_indices = @transform_4, window_bounds = array<i64: 8, 1000>}]} {
    %c0_i32 = arith.constant 0 : i32
    %0 = arith.cmpi eq, %arg1, %c0_i32 : i32
    %1 = arith.extui %0 : i1 to i32
    %c0_i32_0 = arith.constant 0 : i32
    %2 = arith.cmpi ne, %1, %c0_i32_0 : i32
    scf.if %2 {
      %c0_8 = arith.constant 0 : index
      %c0_9 = arith.constant 0 : index
      %10 = vector.load %arg2[%c0_8, %c0_9] : memref<8x1000xf32, #tpu.memory_space<vmem>>, vector<8x1000xf32>
      %c0_10 = arith.constant 0 : index
      %c0_11 = arith.constant 0 : index
      %11 = vector.load %arg3[%c0_10, %c0_11] : memref<10x1000xf32, #tpu.memory_space<vmem>>, vector<10x1000xf32>
      %cst_12 = arith.constant dense<0.000000e+00> : vector<8x10xf32>
      %12 = tpu.matmul %10, %11, %cst_12 {dimension_numbers = #tpu.dot_dimension_numbers<[1], [1], [0], [0], [0, 0, 1, 0], [], []>} : vector<8x1000xf32>, vector<10x1000xf32>, vector<8x10xf32> -> vector<8x10xf32>
      %c0_13 = arith.constant 0 : index
      %c0_14 = arith.constant 0 : index
      %13 = vector.load %arg7[%c0_13, %c0_14] : memref<8x10xf32, #tpu.memory_space<vmem>>, vector<8x10xf32>
      tpu.vector_store %arg7[%c0_13, %c0_14], %12 {strides = array<i32>} : memref<8x10xf32, #tpu.memory_space<vmem>>, vector<8x10xf32>,
    } else {
    }
    %c0 = arith.constant 0 : index
    %c0_1 = arith.constant 0 : index
    %3 = vector.load %arg7[%c0, %c0_1] : memref<8x10xf32, #tpu.memory_space<vmem>>, vector<8x10xf32>
    %c0_2 = arith.constant 0 : index
    %c0_3 = arith.constant 0 : index
    %4 = vector.load %arg4[%c0_2, %c0_3] : memref<10x1000xf32, #tpu.memory_space<vmem>>, vector<10x1000xf32>
    %cst = arith.constant dense<0.000000e+00> : vector<8x1000xf32>
    %5 = tpu.matmul %3, %4, %cst {dimension_numbers = #tpu.dot_dimension_numbers<[1], [0], [0], [1], [0, 0, 1, 1], [], []>} : vector<8x10xf32>, vector<10x1000xf32>, vector<8x1000xf32> -> vector<8x1000xf32>
    %c0_4 = arith.constant 0 : index
    %c0_5 = arith.constant 0 : index
    %6 = vector.load %arg5[%c0_4, %c0_5] : memref<1x1000xf32, #tpu.memory_space<vmem>>, vector<1x1000xf32>
    %7 = vector.broadcast %6 : vector<1x1000xf32> to vector<8x1000xf32>
    %8 = arith.addf %5, %7 : vector<8x1000xf32>
    %c0_6 = arith.constant 0 : index
    %c0_7 = arith.constant 0 : index
    %9 = vector.load %arg6[%c0_6, %c0_7] : memref<8x1000xf32, #tpu.memory_space<vmem>>, vector<8x1000xf32>
    tpu.vector_store %arg6[%c0_6, %c0_7], %8 {strides = array<i32>} : memref<8x1000xf32, #tpu.memory_space<vmem>>, vector<8x1000xf32>,
    return
  }
  func.func @transform_0(%arg0: i32, %arg1: i32) -> (i32, i32) {
    %c0_i32 = arith.constant 0 : i32
    %c0_i32_0 = arith.constant 0 : i32
    return %arg0, %c0_i32 : i32, i32
  }
  func.func @transform_1(%arg0: i32, %arg1: i32) -> (i32, i32) {
    %c0_i32 = arith.constant 0 : i32
    %c0_i32_0 = arith.constant 0 : i32
    %c0_i32_1 = arith.constant 0 : i32
    return %c0_i32, %c0_i32_0 : i32, i32
  }
  func.func @transform_2(%arg0: i32, %arg1: i32) -> (i32, i32) {
    %c0_i32 = arith.constant 0 : i32
    %c0_i32_0 = arith.constant 0 : i32
    return %c0_i32, %arg1 : i32, i32
  }
  func.func @transform_3(%arg0: i32, %arg1: i32) -> (i32, i32) {
    %c0_i32 = arith.constant 0 : i32
    %c0_i32_0 = arith.constant 0 : i32
    return %c0_i32, %arg1 : i32, i32
  }
  func.func @transform_4(%arg0: i32, %arg1: i32) -> (i32, i32) {
    %c0_i32 = arith.constant 0 : i32
    return %arg0, %arg1 : i32, i32
  }
}

</mosaic_0001>

<bundles_post_ra>
// kernel: tpu_custom_call.1
= control target key start
LH: loop header
LB: loop body
LE: loop exit
PB: predicated region body
PF: predicated region fallthrough
CT: control target
= control target key end

     0   :  { %9 = vsyncpa [#allocation4], 0  ;;  %s1056_s0 = inlined_call_operand.hbm [shape: f32[8,1000], index: 0, kind: input, shape index: {}]   ;;  %s1057_s1 = inlined_call_operand.hbm [shape: f32[10,1000], index: 1, kind: input, shape index: {}]   ;;  %s1058_s2 = inlined_call_operand.hbm [shape: f32[10,1000], index: 2, kind: input, shape index: {}]   ;;  %s1059_s3 = inlined_call_operand.vmem [shape: f32[1,1000], index: 3, kind: input, shape index: {}]   ;;  %s1060_s4 = inlined_call_operand.hbm [shape: f32[8,1000], index: 4, kind: output, shape index: {}]  }
   0x1   :  { %10 = vsyncpa [#allocation7], 0 }
   0x2   :  { %11 = vsyncpa [#allocation5], 0  ;;  %s937_s15 = smov [#allocation6]   ;;  %s843_s19 = scalar_lea.hbm %s1057_s1, 2048 }
   0x3   :  { %s27_s16 = sshll.u32 %s937_s15, 4  ;;  %p844_p0 = scmp.ne.s32.totalorder %s1057_s1, %s843_s19  ;;  %s28_s16 = int_to_ptr.vmem [resolvable:$true] %s27_s16 }
   0x4   :  { %p847_p1 = scmp.lt.u32.totalorder %s843_s19, %s1057_s1 }
   0x6   :  { %p849_p2 = pnand %p847_p1, %p844_p0 }
   0x8   :  { %852 = shalt.err (!%p849_p2)
}
   0x9   :  { %s853_s24 = scalar_lea.vmem %s28_s16, 2048  ;;  %p858_p4 = scmp.lt.s32.totalorder %s28_s16, %s28_s16 }
   0xa   :  { %p854_p3 = scmp.ne.s32.totalorder %s28_s16, %s853_s24  ;;  %p859_p5 = scmp.lt.s32.totalorder %s853_s24, %s853_s24 }
   0xc   :  { %p860_p6 = por %p859_p5, %p858_p4 }
   0xe   :  { %p861_p7 = pnand %p860_p6, %p854_p3 }
  0x10   :  { %864 = shalt.err (!%p861_p7)
}
  0x11   :  { %s938_s25 = smov 1024   ;;  %s939_s26 = smov 64  }
  0x12   :  { %33 = dma.hbm_to_vmem [thread:$0]  %s1057_s1, 2048, %s28_s16, [#allocation7], %s938_s25, %s938_s25, %s939_s26  }
  0x13   :  { %s940_s29 = smov [#allocation3]   ;;  %s941_s5 = smov [#allocation8]  }
  0x14   :  { %s18_s30 = sshll.u32 %s940_s29, 4  ;;  %s39_s6 = sshll.u32 %s941_s5, 4  ;;  %s19_s30 = int_to_ptr.vmem [resolvable:$true] %s18_s30  ;;  %s40_s6 = int_to_ptr.vmem [resolvable:$true] %s39_s6 }
  0x15   :  { %s865_s9 = scalar_lea.hbm %s1056_s0, 1024 }
  0x16   :  { %p866_p8 = scmp.ne.s32.totalorder %s1056_s0, %s865_s9  ;;  %p869_p9 = scmp.lt.u32.totalorder %s865_s9, %s1056_s0 }
  0x18   :  { %p871_p10 = pnand %p869_p9, %p866_p8 }
  0x1a   :  { %874 = shalt.err (!%p871_p10)
}
  0x1b   :  { %s875_s1 = scalar_lea.vmem %s19_s30, 1024  ;;  %p880_p12 = scmp.lt.s32.totalorder %s19_s30, %s19_s30 }
  0x1c   :  { %p876_p11 = scmp.ne.s32.totalorder %s19_s30, %s875_s1  ;;  %p881_p13 = scmp.lt.s32.totalorder %s875_s1, %s875_s1 }
  0x1e   :  { %p882_p0 = por %p881_p13, %p880_p12 }
  0x20   :  { %p883_p1 = pnand %p882_p0, %p876_p11 }
  0x22   :  { %886 = shalt.err (!%p883_p1)
}
  0x23   :  { %21 = dma.hbm_to_vmem [thread:$0]  %s1056_s0, 1024, %s19_s30, [#allocation4]  }
  0x24   :  { %s887_s18 = scalar_lea.hbm %s1058_s2, 2048 }
  0x25   :  { %p888_p2 = scmp.ne.s32.totalorder %s1058_s2, %s887_s18  ;;  %p891_p3 = scmp.lt.u32.totalorder %s887_s18, %s1058_s2 }
  0x27   :  { %p893_p4 = pnand %p891_p3, %p888_p2 }
  0x29   :  { %896 = shalt.err (!%p893_p4)
}
  0x2a   :  { %s897_s23 = scalar_lea.vmem %s40_s6, 2048  ;;  %p902_p6 = scmp.lt.s32.totalorder %s40_s6, %s40_s6 }
  0x2b   :  { %p898_p5 = scmp.ne.s32.totalorder %s40_s6, %s897_s23  ;;  %p903_p7 = scmp.lt.s32.totalorder %s897_s23, %s897_s23 }
  0x2d   :  { %p904_p8 = por %p903_p7, %p902_p6 }
  0x2f   :  { %p905_p9 = pnand %p904_p8, %p898_p5 }
  0x31   :  { %908 = shalt.err (!%p905_p9)
}
  0x32   :  { %45 = dma.hbm_to_vmem [thread:$0]  %s1058_s2, 2048, %s40_s6, [#allocation7], %s938_s25, %s938_s25, %s939_s26  }
  0x33   :  { %931 = dma.done.wait [#allocation4], 1024  }
  0x34   :  { %932 = vsyncadd [#allocation4], 4294966272 }
  0x35   :  { %933 = dma.done.wait [#allocation7], 4096  }
  0x36   :  { %934 = vsyncadd [#allocation7], 4294963200  ;;  %v72_v0 = vld [vmem:[#allocation6 + $0x18] sm:$0xff]  ;;  %v71_v2 = vld [vmem:[#allocation6 + $0x10] sm:$0xff]  ;;  %vm85_vm0 = vcmask 850944   ;;  %vm440_vm2 = vcmask 1041408  }
  0x37   :  { %v80_v1 = vld [vmem:[#allocation6 + $0x58] sm:$0x3]  ;;  %v79_v4 = vld [vmem:[#allocation6 + $0x50] sm:$0x3]  ;;  %v74_v7 = vld [vmem:[#allocation6 + $0x28] sm:$0xff]  ;;  %vm942_vm3 = vmmov 1  }
  0x38   :  { %v793_v3 = vpack.c.bf16 %v80_v1, %v72_v0  ;;  %v64_v5 = vld [vmem:[#allocation3 + $0x18] sm:$0xff]  ;;  %v795_v6 = vpack.c.bf16 %v79_v4, %v71_v2  ;;  %v82_v8 = vld [vmem:[#allocation6 + $0x68] sm:$0x3]  ;;  %v73_v11 = vld [vmem:[#allocation6 + $0x20] sm:$0xff]  ;;  %v943_v39 = vmov 0.0   ;;  %vm375_vm5 = vcmask 80896  }
  0x39   :  { %229 = vmatprep.mubr.f32.mxu0 %v64_v5  ;;  %v797_v9 = vpack.c.bf16 %v82_v8, %v74_v7  ;;  %v70_v10 = vld [vmem:[#allocation6 + $0x8] sm:$0xff]  ;;  %v81_v13 = vld [vmem:[#allocation6 + $0x60] sm:$0x3]  ;;  %v76_v17 = vld [vmem:[#allocation6 + $0x38] sm:$0xff]  ;;  %v396_v0 = vlaneseq }
  0x3a   :  { %794 = vmatprep.subr.bf16.mxu0 %v793_v3  ;;  %v78_v12 = vld [vmem:[#allocation6 + $0x48] sm:$0x3]  ;;  %v69_v15 = vld [vmem:[#allocation6] sm:$0xff]  ;;  %v84_v18 = vld [vmem:[#allocation6 + $0x78] sm:$0x3]  ;;  %v799_v22 = vpack.c.bf16 %v81_v13, %v73_v11 }
  0x3b   :  { %796 = vmatpush1.bf16.xpose.msra.mxu0 %v795_v6  ;;  %v789_v14 = vpack.c.bf16 %v78_v12, %v70_v10  ;;  %v77_v16 = vld [vmem:[#allocation6 + $0x40] sm:$0x3]  ;;  %v62_v20 = vld [vmem:[#allocation3 + $0x8] sm:$0xff]  ;;  %v63_v21 = vld [vmem:[#allocation3 + $0x10] sm:$0xff]  ;;  %v801_v24 = vpack.c.bf16 %v84_v18, %v76_v17  ;;  %v397_v1 = vshrl.u32 %v396_v0, 7 }
  0x3c   :  { %798 = vmatprep.subr.bf16.mxu0 %v797_v9  ;;  %v791_v19 = vpack.c.bf16 %v77_v16, %v69_v15  ;;  %159 = vmatprep.mubr.f32.mxu1 %v62_v20  ;;  %v66_v23 = vld [vmem:[#allocation3 + $0x28] sm:$0xff]  ;;  %vm802_vm1 = vmpackc.low %vm85_vm0, %vm85_vm0  ;;  %v61_v25 = vld [vmem:[#allocation3] sm:$0xff] }
  0x3d   :  { %790 = vmatprep.subr.bf16.mxu1 %v789_v14  ;;  %v75_v26 = vld [vmem:[#allocation6 + $0x30] sm:$0xff]  ;;  %v65_v28 = vld [vmem:[#allocation3 + $0x20] sm:$0xff]  ;;  %v68_v30 = vld [vmem:[#allocation3 + $0x38] sm:$0xff]  ;;  %v398_v2 = vsub.s32 0, %v397_v1  ;;  %v402_v4 = vsub.s32 1, %v397_v1  ;;  %v406_v6 = vsub.s32 2, %v397_v1 }
  0x3e   :  { %792 = vmatpush1.bf16.xpose.msra.mxu1 %v791_v19  ;;  %v83_v27 = vld [vmem:[#allocation6 + $0x70] sm:$0x3]  ;;  %v379_v32 = vld [vmem:[#allocation8 + $0x8] sm:$0xff]  ;;  %v378_v34 = vld [vmem:[#allocation8] sm:$0xff]  ;;  %v410_v8 = vsub.s32 3, %v397_v1  ;;  %v414_v13 = vsub.s32 4, %v397_v1 }
  0x3f   :  { %v804_v29 = vpack.c.bf16 %v83_v27, %v75_v26  ;;  %v67_v31 = vld [vmem:[#allocation3 + $0x30] sm:$0xff]  ;;  %v387_v33 = vld [vmem:[#allocation8 + $0x48] sm:$0x3]  ;;  %vm1015_vm4 = vmpackc.low %vm440_vm2, %vm942_vm3  ;;  %v418_v16 = vsub.s32 5, %v397_v1 }
  0x40   :  { %v806_v35 = vpack.c.bf16 %v387_v33, %v379_v32  ;;  %v386_v37 = vld [vmem:[#allocation8 + $0x40] sm:$0x3]  ;;  %v381_v40 = vld [vmem:[#allocation8 + $0x18] sm:$0xff]  ;;  %v380_v48 = vld [vmem:[#allocation8 + $0x10] sm:$0xff] }
  0x41   :  { %v809_v38 = vpack.c.bf16 %v386_v37, %v378_v34  ;;  %v389_v41 = vld [vmem:[#allocation8 + $0x58] sm:$0x3]  ;;  %v388_v49 = vld [vmem:[#allocation8 + $0x50] sm:$0x3]  ;;  %v383_v50 = vld [vmem:[#allocation8 + $0x28] sm:$0xff] }
  0x42   :  { %230 = vmatmul.mubr.f32.vlgmr.msra.gmra.mrb[0].mxu0 %v63_v21  ;;  %808 = vmatprep.subr.msk.bf16.mxu1 %vm1015_vm4, %v806_v35  ;;  %v812_v42 = vpack.c.bf16 %v389_v41, %v381_v40  ;;  %v391_v51 = vld [vmem:[#allocation8 + $0x68] sm:$0x3]  ;;  %v815_v52 = vpack.c.bf16 %v388_v49, %v380_v48  ;;  %v382_v54 = vld [vmem:[#allocation8 + $0x20] sm:$0xff]  ;;  %v385_v57 = vld [vmem:[#allocation8 + $0x38] sm:$0xff]  ;;  %v422_v21 = vsub.s32 6, %v397_v1 }
  0x43   :  { %800 = vmatpush1.bf16.xpose.msra.mxu0 %v799_v22  ;;  %299 = vmatprep.mubr.f32.mxu0 %v66_v23  ;;  %v818_v53 = vpack.c.bf16 %v391_v51, %v383_v50  ;;  %v390_v55 = vld [vmem:[#allocation8 + $0x60] sm:$0x3]  ;;  %v393_v58 = vld [vmem:[#allocation8 + $0x78] sm:$0x3]  ;;  %v384_v61 = vld [vmem:[#allocation8 + $0x30] sm:$0xff] }
  0x44   :  { %803 = vmatprep.subr.msk.bf16.mxu0 %vm802_vm1, %v801_v24  ;;  %v821_v59 = vpack.c.bf16 %v390_v55, %v382_v54  ;;  %v824_v60 = vpack.c.bf16 %v393_v58, %v385_v57  ;;  %v392_v62 = vld [vmem:[#allocation8 + $0x70] sm:$0x3]  ;;  %v394_v3 = vld [vmem:[%s1059_s3] sm:$0xff]  ;;  %v426_v24 = vsub.s32 7, %v397_v1  ;;  %s944_s3 = smov [#allocation9]  }
  0x45   :  { %160 = vmatmul.mubr.f32.vlgmr.msra.gmra.mrb[0].mxu1 %v61_v25  ;;  %v827_v63 = vpack.c.bf16 %v392_v62, %v384_v61  ;;  %v399_v5 = vrot.slane %v394_v3, %v398_v2  ;;  %v403_v7 = vrot.slane %v394_v3, %v402_v4  ;;  %v407_v12 = vrot.slane %v394_v3, %v406_v6  ;;  %s764_s26 = sshll.u32 %s944_s3, 4  ;;  %s765_s26 = int_to_ptr.vmem [resolvable:$true] %s764_s26 }
  0x46   :  { %529 = vmatprep.mubr.f32.mxu1 %v943_v39  ;;  %811 = vmatpush1.bf16.msk.msra.mxu1 %vm1015_vm4, %v809_v38  ;;  %v411_v15 = vrot.slane %v394_v3, %v410_v8  ;;  %v415_v20 = vrot.slane %v394_v3, %v414_v13  ;;  %v419_v23 = vrot.slane %v394_v3, %v418_v16  ;;  %s909_s27 = scalar_lea.vmem %s765_s26, 1024  ;;  %p914_p11 = scmp.lt.s32.totalorder %s765_s26, %s765_s26 }
  0x47   :  { %814 = vmatprep.subr.msk.bf16.mxu1 %vm1015_vm4, %v812_v42  ;;  %p910_p10 = scmp.ne.s32.totalorder %s765_s26, %s909_s27  ;;  %p915_p12 = scmp.lt.s32.totalorder %s909_s27, %s909_s27 }
  0x49   :  { %p916_p13 = por %p915_p12, %p914_p11 }
  0x4a   :  { %300 = vmatmul.mubr.f32.vlgmr.msra.gmra.mrb[0].mxu0 %v65_v28  ;;  %v423_v28 = vrot.slane %v394_v3, %v422_v21 }
  0x4b   :  { %805 = vmatpush1.bf16.xpose.msra.mxu0 %v804_v29  ;;  %776 = vmatprep.mubr.msk.f32.mxu0 %vm85_vm0, %v68_v30  ;;  %v427_v30 = vrot.slane %v394_v3, %v426_v24  ;;  %p917_p0 = pnand %p916_p13, %p910_p10 }
  0x52   :  { %370 = vmatmul.mubr.f32.vlgmr.msra.gmra.mrb[0].mxu0 %v67_v31 }
 0x118   :  { %v161_v43 = vpop.f32.mrb[0].mxu1 }
 0x119   :  { %v163_v44 = vpop.f32.mrb[1].mxu1 }
 0x125   :  { %v371_v45 = vpop.f32.mrb[0].mxu0 }
 0x126   :  { %v830_v46 = vadd.f32 %v371_v45, %v161_v43  ;;  %v373_v47 = vpop.f32.mrb[1].mxu0 }
 0x128   :  { %376 = vst.msk [vmem:[#allocation2] sm:$0xff] %vm375_vm5, %v830_v46 }
 0x12f   :  { %v377_v56 = vld [vmem:[#allocation2] sm:$0xff] }
 0x130   :  { %779 = vmatmul.mubr.msk.f32.vlgmr.msra.gmra.mrb[2].mxu1 %vm375_vm5, %v377_v56 }
 0x131   :  { %817 = vmatpush1.bf16.msk.msra.mxu1 %vm1015_vm4, %v815_v52  ;;  %600 = vmatprep.mubr.f32.mxu1 %v943_v39 }
 0x132   :  { %820 = vmatprep.subr.msk.bf16.mxu1 %vm1015_vm4, %v818_v53 }
 0x134   :  { %782 = vmatmul.mubr.msk.f32.vlgmr.msra.gmra.mrb[4].mxu1 %vm375_vm5, %v377_v56 }
 0x135   :  { %823 = vmatpush1.bf16.msk.msra.mxu1 %vm1015_vm4, %v821_v59  ;;  %671 = vmatprep.mubr.f32.mxu1 %v943_v39 }
 0x136   :  { %826 = vmatprep.subr.msk.bf16.mxu1 %vm1015_vm4, %v824_v60 }
 0x138   :  { %785 = vmatmul.mubr.msk.f32.vlgmr.msra.gmra.mrb[6].mxu1 %vm375_vm5, %v377_v56 }
 0x139   :  { %829 = vmatpush1.bf16.msk.msra.mxu1 %vm1015_vm4, %v827_v63  ;;  %742 = vmatprep.mubr.f32.mxu1 %v943_v39 }
 0x13c   :  { %788 = vmatmul.mubr.msk.f32.vlgmr.msra.gmra.mrb[8].mxu1 %vm375_vm5, %v377_v56 }
 0x203   :  { %v531_v9 = vpop.f32.mrb[2].mxu1 }
 0x204   :  { %v532_v10 = vadd.f32 %v531_v9, %v399_v5  ;;  %v533_v11 = vpop.f32.mrb[3].mxu1 }
 0x205   :  { %v534_v14 = vadd.f32 %v533_v11, %v403_v7 }
 0x206   :  { %749 = vst [vmem:[#allocation9] sm:$0xff] %v532_v10 }
 0x207   :  { %750 = vst [vmem:[#allocation9 + $0x8] sm:$0xff] %v534_v14  ;;  %v602_v17 = vpop.f32.mrb[4].mxu1 }
 0x208   :  { %v603_v18 = vadd.f32 %v602_v17, %v407_v12  ;;  %v604_v19 = vpop.f32.mrb[5].mxu1 }
 0x209   :  { %v605_v22 = vadd.f32 %v604_v19, %v411_v15 }
 0x20a   :  { %751 = vst [vmem:[#allocation9 + $0x10] sm:$0xff] %v603_v18 }
 0x20b   :  { %752 = vst [vmem:[#allocation9 + $0x18] sm:$0xff] %v605_v22  ;;  %v673_v25 = vpop.f32.mrb[6].mxu1 }
 0x20c   :  { %v674_v26 = vadd.f32 %v673_v25, %v415_v20  ;;  %v675_v27 = vpop.f32.mrb[7].mxu1 }
 0x20d   :  { %v676_v29 = vadd.f32 %v675_v27, %v419_v23 }
 0x20e   :  { %753 = vst [vmem:[#allocation9 + $0x20] sm:$0xff] %v674_v26 }
 0x20f   :  { %754 = vst [vmem:[#allocation9 + $0x28] sm:$0xff] %v676_v29  ;;  %v744_v31 = vpop.f32.mrb[8].mxu1 }
 0x210   :  { %v745_v32 = vadd.f32 %v744_v31, %v423_v28  ;;  %v746_v33 = vpop.f32.mrb[9].mxu1 }
 0x211   :  { %v747_v34 = vadd.f32 %v746_v33, %v427_v30 }
 0x212   :  { %755 = vst [vmem:[#allocation9 + $0x30] sm:$0xff] %v745_v32 }
 0x213   :  { %757 = vst.msk [vmem:[#allocation9 + $0x38] sm:$0xff] %vm85_vm0, %v747_v34 }
 0x214   :  { %920 = shalt.err (!%p917_p0)
}
 0x215   :  { %s921_s30 = scalar_lea.hbm %s1060_s4, 1024 }
 0x216   :  { %p922_p1 = scmp.ne.s32.totalorder %s1060_s4, %s921_s30  ;;  %p925_p2 = scmp.lt.u32.totalorder %s921_s30, %s1060_s4 }
 0x218   :  { %p927_p3 = pnand %p925_p2, %p922_p1 }
 0x21a   :  { %930 = shalt.err (!%p927_p3)
}
 0x21b   :  { %767 = dma.vmem_to_hbm [thread:$0]  %s765_s26, 1024, %s1060_s4, [#allocation5]  }
 0x21c   :  { %935 = dma.done.wait [#allocation5], 1024  }
 0x21d   :  { %936 = vsyncadd [#allocation5], 4294966272 }
 0x21e   :  { %771 = vsyncpa [#allocation4], 1 }
 0x21f   :  { %772 = vsyncpa [#allocation7], 1 }
 0x220   :  { %773 = vsyncpa [#allocation5], 1 }

</bundles_post_ra>
